<compile_context>
chip_gen: v5e
topology: v5e:2x2
jax: 0.10.0
libtpu: 0.0.40
codegen_flags: <defaults>
</compile_context>

<pallas_src>
import functools
import math

import jax
import jax.numpy as jnp
from jax.experimental import pallas as pl
from jax.experimental.pallas import tpu as pltpu

TWO_PI = 2.0 * math.pi


def _cos_border_loss_kernel(rows_ref, pred_ref, target_ref, out_ref, *, needs_mask):
    p = pred_ref[...]
    t = target_ref[...]

    # |cos(p - t) - cos(t - t)| == |cos(p - t) - 1| == 1 - cos(p - t)
    radial = 1.0 - jnp.cos(p - t)
    # relu(p - 2*pi) + relu(-p)
    border = jnp.maximum(p - TWO_PI, 0.0) + jnp.maximum(-p, 0.0)
    val = radial + border

    if needs_mask:
        # Mask rows of the (possibly ragged) last block that lie past the
        # real row count (those buffer rows contain undefined data).
        block_rows = p.shape[0]
        row_ids = (pl.program_id(0) * block_rows
                   + jax.lax.broadcasted_iota(jnp.int32, p.shape, 0))
        val = jnp.where(row_ids < rows_ref[0], val, 0.0)

    # Sublane-only reduction -> one lane-dense partial row per grid step.
    out_ref[...] = jnp.sum(val, axis=0, keepdims=True)[None]


def _choose_layout(n):
    """Pick the widest lane-dense width that divides n (avoids host padding)."""
    for lanes in (2048, 1024, 512, 256, 128):
        if n % lanes == 0:
            return lanes, 0
    # Rare fallback: tiny (<128-element) zero pad; zeros contribute 0 loss.
    return 128, (-n) % 128


def cos_border_loss(pred, target):
    """Pallas TPU implementation of CosBorderLoss.forward -> scalar float32."""
    assert pred.shape == target.shape
    flat_p = pred.reshape(-1).astype(jnp.float32)
    flat_t = target.reshape(-1).astype(jnp.float32)
    n = flat_p.shape[0]

    lanes, pad = _choose_layout(n)
    if pad:
        # Zero padding contributes 0: 1 - cos(0) = 0, relu(-0) = relu(0-2pi) = 0.
        flat_p = jnp.pad(flat_p, (0, pad))
        flat_t = jnp.pad(flat_t, (0, pad))
    rows = (n + pad) // lanes

    # ~2 MiB f32 per input block (512Ki elements) -> near HBM roofline while
    # keeping 2 inputs x 2 pipeline buffers ~= 8 MiB, well under scoped VMEM.
    target_rows = max(1, (512 * 1024) // lanes)
    if target_rows >= rows:
        block_rows = rows                              # full dim -> always legal
    else:
        block_rows = max(8, (target_rows // 8) * 8)    # multiple of 8 sublanes

    num_blocks = pl.cdiv(rows, block_rows)
    needs_mask = (num_blocks * block_rows != rows)

    p2 = flat_p.reshape(rows, lanes)
    t2 = flat_t.reshape(rows, lanes)
    rows_smem = jnp.array([rows], dtype=jnp.int32)

    kernel = functools.partial(_cos_border_loss_kernel, needs_mask=needs_mask)

    n_elems = rows * lanes
    cost = pl.CostEstimate(
        flops=9 * n_elems,
        transcendentals=n_elems,
        bytes_accessed=2 * 4 * n_elems + 4 * num_blocks * lanes,
    )

    partial = pl.pallas_call(
        kernel,
        out_shape=jax.ShapeDtypeStruct((num_blocks, 1, lanes), jnp.float32),
        grid_spec=pltpu.PrefetchScalarGridSpec(
            num_scalar_prefetch=1,
            grid=(num_blocks,),
            in_specs=[
                pl.BlockSpec((block_rows, lanes), lambda i, rows_ref: (i, 0)),
                pl.BlockSpec((block_rows, lanes), lambda i, rows_ref: (i, 0)),
            ],
            out_specs=pl.BlockSpec((1, 1, lanes), lambda i, rows_ref: (i, 0, 0)),
        ),
        compiler_params=pltpu.CompilerParams(
            dimension_semantics=("parallel",),
        ),
        cost_estimate=cost,
    )(rows_smem, p2, t2)

    # Tiny final cross-block / cross-lane reduction (XLA tree reduce).
    return jnp.sum(partial)


def _reference(pred, target):
    radial = jnp.abs(jnp.cos(pred - target) - jnp.cos(target - target))
    border = jax.nn.relu(pred - TWO_PI) + jax.nn.relu(-pred)
    return jnp.sum(radial + border)


if __name__ == "__main__":
    key = jax.random.PRNGKey(0)
    k1, k2 = jax.random.split(key)
    # Small NCHW-shaped inputs (angle predictions / targets).
    pred = jax.random.uniform(k1, (2, 4, 16, 16), jnp.float32,
                              minval=-1.0, maxval=2.0 * TWO_PI)
    target = jax.random.uniform(k2, (2, 4, 16, 16), jnp.float32,
                                minval=0.0, maxval=TWO_PI)

    loss = cos_border_loss(pred, target)
    loss = jax.block_until_ready(loss)

    ref = _reference(pred, target)
    assert jnp.allclose(loss, ref, rtol=1e-5, atol=1e-5), (loss, ref)
    print("KERNEL_OK")
</pallas_src>

<mosaic_0001>
module attributes {stable_mosaic.version = 11 : i64} {
  func.func @_cos_border_loss_kernel(%arg0: i32, %arg1: memref<1xi32, #tpu.memory_space<smem>>, %arg2: memref<1x2048xf32, #tpu.memory_space<vmem>>, %arg3: memref<1x2048xf32, #tpu.memory_space<vmem>>, %arg4: memref<1x1x2048xf32, #tpu.memory_space<vmem>>) attributes {dimension_semantics = [#tpu.dimension_semantics<parallel>], iteration_bounds = array<i64: 1>, scalar_prefetch = 1 : i64, scratch_operands = 0 : i64, tpu.core_type = #tpu.core_type<tc>, window_params = [{transform_indices = @transform_0, window_bounds = array<i64: 1, 2048>}, {transform_indices = @transform_1, window_bounds = array<i64: 1, 2048>}, {transform_indices = @transform_2, window_bounds = array<i64: 1, 1, 2048>}]} {
    %c0 = arith.constant 0 : index
    %c0_0 = arith.constant 0 : index
    %0 = vector.load %arg2[%c0, %c0_0] : memref<1x2048xf32, #tpu.memory_space<vmem>>, vector<1x2048xf32>
    %c0_1 = arith.constant 0 : index
    %c0_2 = arith.constant 0 : index
    %1 = vector.load %arg3[%c0_1, %c0_2] : memref<1x2048xf32, #tpu.memory_space<vmem>>, vector<1x2048xf32>
    %2 = arith.subf %0, %1 : vector<1x2048xf32>
    %3 = math.cos %2 : vector<1x2048xf32>
    %cst = arith.constant 1.000000e+00 : f32
    %4 = vector.broadcast %cst : f32 to vector<1x2048xf32>
    %5 = arith.subf %4, %3 : vector<1x2048xf32>
    %cst_3 = arith.constant 6.28318548 : f32
    %6 = vector.broadcast %cst_3 : f32 to vector<1x2048xf32>
    %7 = arith.subf %0, %6 : vector<1x2048xf32>
    %cst_4 = arith.constant 0.000000e+00 : f32
    %8 = vector.broadcast %cst_4 : f32 to vector<1x2048xf32>
    %9 = arith.maximumf %7, %8 : vector<1x2048xf32>
    %cst_5 = arith.constant 0.000000e+00 : f32
    %10 = vector.broadcast %cst_5 : f32 to vector<1x2048xf32>
    %11 = arith.subf %10, %0 : vector<1x2048xf32>
    %cst_6 = arith.constant 0.000000e+00 : f32
    %12 = vector.broadcast %cst_6 : f32 to vector<1x2048xf32>
    %13 = arith.maximumf %11, %12 : vector<1x2048xf32>
    %14 = arith.addf %9, %13 : vector<1x2048xf32>
    %15 = arith.addf %5, %14 : vector<1x2048xf32>
    %cst_7 = arith.constant dense<0.000000e+00> : vector<2048xf32>
    %16 = vector.multi_reduction <add>, %15, %cst_7 [0] : vector<1x2048xf32> to vector<2048xf32>
    %17 = vector.shape_cast %16 : vector<2048xf32> to vector<1x2048xf32>
    %18 = vector.shape_cast %17 : vector<1x2048xf32> to vector<1x1x2048xf32>
    %c0_8 = arith.constant 0 : index
    %c0_9 = arith.constant 0 : index
    %c0_10 = arith.constant 0 : index
    %19 = vector.load %arg4[%c0_8, %c0_9, %c0_10] : memref<1x1x2048xf32, #tpu.memory_space<vmem>>, vector<1x1x2048xf32>
    tpu.vector_store %arg4[%c0_8, %c0_9, %c0_10], %18 {strides = array<i32>} : memref<1x1x2048xf32, #tpu.memory_space<vmem>>, vector<1x1x2048xf32>,
    return
  }
  func.func @transform_0(%arg0: i32, %arg1: memref<1xi32, #tpu.memory_space<smem>>) -> (i32, i32) {
    %c0_i32 = arith.constant 0 : i32
    %c0_i32_0 = arith.constant 0 : i32
    return %arg0, %c0_i32 : i32, i32
  }
  func.func @transform_1(%arg0: i32, %arg1: memref<1xi32, #tpu.memory_space<smem>>) -> (i32, i32) {
    %c0_i32 = arith.constant 0 : i32
    %c0_i32_0 = arith.constant 0 : i32
    return %arg0, %c0_i32 : i32, i32
  }
  func.func @transform_2(%arg0: i32, %arg1: memref<1xi32, #tpu.memory_space<smem>>) -> (i32, i32, i32) {
    %c0_i32 = arith.constant 0 : i32
    %c0_i32_0 = arith.constant 0 : i32
    %c0_i32_1 = arith.constant 0 : i32
    return %arg0, %c0_i32, %c0_i32_0 : i32, i32, i32
  }
}

</mosaic_0001>

<bundles_post_ra>
// kernel: tpu_custom_call.1
= control target key start
LH: loop header
LB: loop body
LE: loop exit
PB: predicated region body
PF: predicated region fallthrough
CT: control target
= control target key end

     0   :  { %9 = vsyncpa [#allocation5], 0  ;;  %s718_s0 = inlined_call_operand.<no memory space> [shape: s32[1], index: 0, kind: input, shape index: {}]   ;;  %s719_s1 = inlined_call_operand.hbm [shape: f32[1,2048], index: 1, kind: input, shape index: {}]   ;;  %s720_s2 = inlined_call_operand.hbm [shape: f32[1,2048], index: 2, kind: input, shape index: {}]   ;;  %s721_s3 = inlined_call_operand.hbm [shape: f32[1,1,2048], index: 3, kind: output, shape index: {}]  }
   0x1   :  { %10 = vsyncpa [#allocation8], 0 }
   0x2   :  { %11 = vsyncpa [#allocation6], 0  ;;  %s17_s14 = sshll.u32 %s719_s1, 4  ;;  %s488_s15 = smov [#allocation4]   ;;  %s18_s14 = int_to_ptr.hbm [resolvable:$true] %s17_s14 }
   0x3   :  { %s19_s16 = sshll.u32 %s488_s15, 4  ;;  %s28_s18 = sshll.u32 %s720_s2, 4  ;;  %s20_s16 = int_to_ptr.vmem [resolvable:$true] %s19_s16  ;;  %s29_s18 = int_to_ptr.hbm [resolvable:$true] %s28_s18 }
   0x4   :  { %22 = dma.hbm_to_vmem [thread:$0]  %s18_s14, 256, %s20_s16, [#allocation5]  }
   0x5   :  { %s489_s19 = smov [#allocation7]  }
   0x6   :  { %s30_s20 = sshll.u32 %s489_s19, 4  ;;  %s31_s20 = int_to_ptr.vmem [resolvable:$true] %s30_s20 }
   0x7   :  { %33 = dma.hbm_to_vmem [thread:$0]  %s29_s18, 256, %s31_s20, [#allocation8]  }
   0x8   :  { %482 = dma.done.wait [#allocation5], 256  }
   0x9   :  { %483 = vsyncadd [#allocation5], 4294967040 }
   0xa   :  { %484 = dma.done.wait [#allocation8], 256  }
   0xb   :  { %485 = vsyncadd [#allocation8], 4294967040  ;;  %v524_v0 = vld [vmem:[#allocation4] sm:$0xff]  ;;  %v526_v1 = vld [vmem:[#allocation4 + $0x8] sm:$0xff]  ;;  %v490_v27 = vmov 683565275  }
   0xc   :  { %v44_v2 = vld [vmem:[#allocation7] sm:$0xff]  ;;  %v45_v3 = vld [vmem:[#allocation7 + $0x8] sm:$0xff]  ;;  %v491_v29 = vmov 2475754826   ;;  %v492_v31 = vmov 2131351028  }
   0xd   :  { %v529_v4 = vsub.f32 %v524_v0, %v44_v2  ;;  %v532_v5 = vsub.f32 %v526_v1, %v45_v3  ;;  %v493_v33 = vmov 2102212464   ;;  %v494_v35 = vmov 920167782   ;;  %s497_s1 = smov [#allocation9]   ;;  %s381_s23 = sshll.u32 %s721_s3, 4  ;;  %s382_s23 = int_to_ptr.hbm [resolvable:$true] %s381_s23 }
   0xe   :  { %v495_v44 = vmov 1326507024   ;;  %s379_s2 = sshll.u32 %s497_s1, 4  ;;  %s380_s2 = int_to_ptr.vmem [resolvable:$true] %s379_s2 }
   0xf   :  { %v48_v6 = vand.u32 2147483647, %v529_v4  ;;  %v51_v7 = vand.u32 2139095040, %v529_v4  ;;  %v202_v8 = vand.u32 2147483647, %v532_v5  ;;  %v205_v9 = vand.u32 2139095040, %v532_v5 }
  0x11   :  { %v52_v10 = vshrl.u32 %v51_v7, 23  ;;  %v55_v11 = vand.u32 8388607, %v48_v6  ;;  %v206_v12 = vshrl.u32 %v205_v9, 23  ;;  %v209_v16 = vand.u32 8388607, %v202_v8 }
  0x13   :  { %v392_v13 = vadd.s32 4294967169, %v52_v10  ;;  %v56_v14 = vor.u32 8388608, %v55_v11  ;;  %v395_v15 = vadd.s32 4294967169, %v206_v12  ;;  %v210_v21 = vor.u32 8388608, %v209_v16 }
  0x15   :  { %v58_v17 = vadd.s32 1, %v392_v13  ;;  %v212_v18 = vadd.s32 1, %v395_v15  ;;  %v542_v20 = vshll.u32 %v56_v14, 8  ;;  %v552_v38 = vshll.u32 %v210_v21, 8 }
  0x17   :  { %vm59_vm0 = vcmp.gt.s32.totalorder %v58_v17, 0  ;;  %vm213_vm1 = vcmp.gt.s32.totalorder %v212_v18, 0  ;;  %v97_v37 = vand.u32 65535, %v542_v20  ;;  %v98_v42 = vshrl.u32 %v542_v20, 16 }
  0x18   :  { %v60_v19 = vsel %vm59_vm0, %v58_v17, 0  ;;  %v214_v23 = vsel %vm213_vm1, %v212_v18, 0 }
  0x19   :  { %v62_v22 = vand.u32 31, %v60_v19  ;;  %v544_v24 = vshrl.u32 %v60_v19, 5  ;;  %v546_v25 = vand.u32 31, %v214_v23  ;;  %v570_v55 = vshrl.u32 %v214_v23, 5 }
  0x1b   :  { %v63_v26 = vsub.s32 32, %v62_v22  ;;  %v65_v28 = vshll.u32 %v490_v27, %v62_v22  ;;  %v68_v30 = vshll.u32 %v491_v29, %v62_v22  ;;  %v71_v32 = vshll.u32 %v492_v31, %v62_v22 }
  0x1c   :  { %v74_v34 = vshll.u32 %v493_v33, %v62_v22  ;;  %v77_v36 = vshll.u32 %v494_v35, %v62_v22  ;;  %vm80_vm2 = vcmp.lt.s32.totalorder %v544_v24, 1  ;;  %vm83_vm3 = vcmp.lt.s32.totalorder %v544_v24, 4 }
  0x1d   :  { %v66_v39 = vshrl.u32 %v491_v29, %v63_v26  ;;  %v69_v40 = vshrl.u32 %v492_v31, %v63_v26  ;;  %v72_v41 = vshrl.u32 %v493_v33, %v63_v26  ;;  %v75_v43 = vshrl.u32 %v494_v35, %v63_v26 }
  0x1e   :  { %v78_v45 = vshrl.u32 %v495_v44, %v63_v26  ;;  %v561_v49 = vsub.s32 32, %v546_v25  ;;  %v64_v50 = vshrl.u32 %v490_v27, %v63_v26  ;;  %vm82_vm4 = vcmp.lt.s32.totalorder %v544_v24, 3 }
  0x1f   :  { %v67_v46 = vor.u32 %v66_v39, %v65_v28  ;;  %v70_v47 = vor.u32 %v69_v40, %v68_v30  ;;  %v73_v48 = vor.u32 %v72_v41, %v71_v32  ;;  %v76_v51 = vor.u32 %v75_v43, %v74_v34 }
  0x20   :  { %v79_v52 = vor.u32 %v78_v45, %v77_v36  ;;  %vm81_vm5 = vcmp.lt.s32.totalorder %v544_v24, 2  ;;  %v219_v58 = vshll.u32 %v490_v27, %v546_v25  ;;  %v222_v59 = vshll.u32 %v491_v29, %v546_v25 }
  0x21   :  { %v88_v53 = vsel %vm80_vm2, %v67_v46, %v70_v47  ;;  %v92_v54 = vsel %vm80_vm2, %v70_v47, %v73_v48  ;;  %v89_v56 = vsel %vm83_vm3, %v76_v51, 920167782  ;;  %v85_v60 = vsel %vm83_vm3, %v73_v48, 2102212464 }
  0x22   :  { %v93_v57 = vsel %vm83_vm3, %v79_v52, 1326507024  ;;  %v90_v61 = vsel %vm82_vm4, %v73_v48, %v89_v56  ;;  %v220_v63 = vshrl.u32 %v491_v29, %v561_v49  ;;  %v84_v2 = vsel %vm80_vm2, %v64_v50, %v67_v46 }
  0x23   :  { %v94_v62 = vsel %vm82_vm4, %v76_v51, %v93_v57  ;;  %v91_v3 = vsel %vm81_vm5, %v88_v53, %v90_v61  ;;  %v223_v9 = vshrl.u32 %v492_v31, %v561_v49  ;;  %v86_v14 = vsel %vm82_vm4, %v70_v47, %v85_v60 }
  0x24   :  { %v95_v7 = vsel %vm81_vm5, %v92_v54, %v94_v62  ;;  %v121_v12 = vand.u32 65535, %v91_v3  ;;  %v122_v13 = vshrl.u32 %v91_v3, 16  ;;  %v595_v15 = vor.u32 %v220_v63, %v219_v58 }
  0x25   :  { %v99_v10 = vand.u32 65535, %v95_v7  ;;  %v100_v11 = vshrl.u32 %v95_v7, 16  ;;  %v597_v16 = vor.u32 %v223_v9, %v222_v59  ;;  %v225_v17 = vshll.u32 %v492_v31, %v546_v25 }
  0x26   :  { %v226_v22 = vshrl.u32 %v493_v33, %v561_v49  ;;  %v123_v26 = vmul.u32 %v121_v12, %v97_v37  ;;  %v124_v28 = vmul.u32 %v122_v13, %v97_v37  ;;  %v125_v29 = vmul.u32 %v121_v12, %v98_v42 }
  0x27   :  { %v101_v18 = vmul.u32 %v99_v10, %v97_v37  ;;  %v102_v19 = vmul.u32 %v100_v11, %v97_v37  ;;  %v103_v21 = vmul.u32 %v99_v10, %v98_v42  ;;  %v104_v23 = vmul.u32 %v100_v11, %v98_v42 }
  0x28   :  { %v126_v36 = vmul.u32 %v122_v13, %v98_v42  ;;  %v127_v40 = vshll.u32 %v124_v28, 16  ;;  %v128_v41 = vshrl.u32 %v124_v28, 16  ;;  %v129_v43 = vshll.u32 %v125_v29, 16 }
  0x29   :  { %v105_v30 = vshll.u32 %v102_v19, 16  ;;  %v106_v32 = vshrl.u32 %v102_v19, 16  ;;  %v107_v34 = vshll.u32 %v103_v21, 16  ;;  %v108_v39 = vshrl.u32 %v103_v21, 16 }
  0x2a   :  { %v130_v45 = vshrl.u32 %v125_v29, 16  ;;  %v228_v46 = vshll.u32 %v493_v33, %v546_v25  ;;  %v496_v47 = vmov 0   ;;  %vm131_vm7 = vc.u32 %v123_v26, %v127_v40 }
  0x2b   :  { %vm109_vm6 = vc.u32 %v101_v18, %v105_v30  ;;  %v111_v31 = vadd.s32 %v105_v30, %v101_v18  ;;  %v133_v37 = vadd.s32 %v127_v40, %v123_v26  ;;  %v229_v50 = vshrl.u32 %v494_v35, %v561_v49 }
  0x2c   :  { %v110_v48 = vsel %vm109_vm6, 1, %v496_v47  ;;  %v132_v42 = vsel %vm131_vm7, 1, %v496_v47  ;;  %v231_v52 = vshll.u32 %v494_v35, %v546_v25  ;;  %v227_v33 = vor.u32 %v226_v22, %v225_v17 }
  0x2d   :  { %v112_v51 = vadd.s32 %v110_v48, %v104_v23  ;;  %vm113_vm8 = vc.u32 %v111_v31, %v107_v34  ;;  %v134_v54 = vadd.s32 %v132_v42, %v126_v36  ;;  %vm135_vm9 = vc.u32 %v133_v37, %v129_v43 }
  0x2e   :  { %v114_v53 = vsel %vm113_vm8, 1, %v496_v47  ;;  %v136_v57 = vsel %vm135_vm9, 1, %v496_v47  ;;  %v230_v58 = vor.u32 %v229_v50, %v228_v46  ;;  %v232_v59 = vshrl.u32 %v495_v44, %v561_v49 }
  0x2f   :  { %v116_v56 = vadd.s32 %v114_v53, %v112_v51  ;;  %v614_v60 = vadd.s32 %v133_v37, %v129_v43  ;;  %v138_v61 = vadd.s32 %v136_v57, %v134_v54  ;;  %vm234_vm10 = vcmp.lt.s32.totalorder %v570_v55, 1 }
  0x30   :  { %vm236_vm11 = vcmp.lt.s32.totalorder %v570_v55, 3  ;;  %v233_v35 = vor.u32 %v232_v59, %v231_v52  ;;  %vm235_vm12 = vcmp.lt.s32.totalorder %v570_v55, 2  ;;  %vm237_vm13 = vcmp.lt.s32.totalorder %v570_v55, 4 }
  0x31   :  { %v117_v25 = vadd.s32 %v116_v56, %v106_v32  ;;  %v87_v62 = vsel %vm81_vm5, %v84_v2, %v86_v14  ;;  %v139_v63 = vadd.s32 %v138_v61, %v128_v41  ;;  %v242_v44 = vsel %vm234_vm10, %v595_v15, %v597_v16 }
  0x32   :  { %v243_v3 = vsel %vm237_vm13, %v230_v58, 920167782  ;;  %v246_v10 = vsel %vm234_vm10, %v597_v16, %v227_v33  ;;  %v251_v24 = vand.u32 65535, %v552_v38  ;;  %v247_v12 = vsel %vm237_vm13, %v233_v35, 1326507024 }
  0x33   :  { %v628_v7 = vadd.s32 %v117_v25, %v108_v39  ;;  %v244_v9 = vsel %vm236_vm11, %v227_v33, %v243_v3  ;;  %v140_v2 = vadd.s32 %v139_v63, %v130_v45  ;;  %v252_v13 = vshrl.u32 %v552_v38, 16 }
  0x34   :  { %v245_v11 = vsel %vm235_vm12, %v242_v44, %v244_v9  ;;  %v141_v14 = vmul.u32 %v542_v20, %v87_v62  ;;  %v248_v17 = vsel %vm236_vm11, %v230_v58, %v247_v12  ;;  %v218_v29 = vshrl.u32 %v490_v27, %v561_v49 }
  0x35   :  { %vm143_vm14 = vc.u32 %v628_v7, %v614_v60  ;;  %v275_v18 = vand.u32 65535, %v245_v11  ;;  %v144_v19 = vadd.s32 1, %v140_v2  ;;  %v249_v21 = vsel %vm235_vm12, %v246_v10, %v248_v17 }
  0x36   :  { %v276_v22 = vshrl.u32 %v245_v11, 16  ;;  %v253_v23 = vand.u32 65535, %v249_v21  ;;  %v254_v26 = vshrl.u32 %v249_v21, 16  ;;  %v239_v31 = vsel %vm237_vm13, %v227_v33, 2102212464 }
  0x37   :  { %v145_v28 = vsel %vm143_vm14, %v144_v19, %v140_v2  ;;  %v279_v20 = vmul.u32 %v275_v18, %v252_v13  ;;  %v277_v39 = vmul.u32 %v275_v18, %v251_v24  ;;  %v238_v48 = vsel %vm234_vm10, %v218_v29, %v595_v15 }
  0x38   :  { %v278_v30 = vmul.u32 %v276_v22, %v251_v24  ;;  %v146_v32 = vadd.s32 %v145_v28, %v141_v14  ;;  %v255_v34 = vmul.u32 %v253_v23, %v251_v24  ;;  %v256_v36 = vmul.u32 %v254_v26, %v251_v24 }
  0x39   :  { %v257_v40 = vmul.u32 %v253_v23, %v252_v13  ;;  %v258_v45 = vmul.u32 %v254_v26, %v252_v13  ;;  %v280_v27 = vmul.u32 %v276_v22, %v252_v13  ;;  %v283_v49 = vshll.u32 %v279_v20, 16 }
  0x3a   :  { %v281_v41 = vshll.u32 %v278_v30, 16  ;;  %v147_v43 = vadd.s32 536870912, %v146_v32  ;;  %v259_v46 = vshll.u32 %v256_v36, 16  ;;  %v240_v42 = vsel %vm236_vm11, %v597_v16, %v239_v31 }
  0x3b   :  { %v261_v37 = vshll.u32 %v257_v40, 16  ;;  %v260_v15 = vshrl.u32 %v256_v36, 16  ;;  %v282_v58 = vshrl.u32 %v278_v30, 16  ;;  %v262_v25 = vshrl.u32 %v257_v40, 16 }
  0x3c   :  { %v655_v50 = vshrl.u32 %v147_v43, 30  ;;  %vm263_vm15 = vc.u32 %v255_v34, %v259_v46  ;;  %v265_v51 = vadd.s32 %v259_v46, %v255_v34  ;;  %vm285_vm0 = vc.u32 %v277_v39, %v281_v41 }
  0x3d   :  { %v264_v52 = vsel %vm263_vm15, 1, %v496_v47  ;;  %v286_v53 = vsel %vm285_vm0, 1, %v496_v47  ;;  %v287_v54 = vadd.s32 %v281_v41, %v277_v39  ;;  %v284_v62 = vshrl.u32 %v279_v20, 16 }
  0x3e   :  { %v149_v33 = vshll.u32 %v655_v50, 30  ;;  %v266_v56 = vadd.s32 %v264_v52, %v258_v45  ;;  %vm267_vm1 = vc.u32 %v265_v51, %v261_v37  ;;  %v288_v59 = vadd.s32 %v286_v53, %v280_v27 }
  0x3f   :  { %v268_v57 = vsel %vm267_vm1, 1, %v496_v47  ;;  %vm289_vm2 = vc.u32 %v287_v54, %v283_v49  ;;  %v291_v9 = vadd.s32 %v287_v54, %v283_v49  ;;  %v241_v10 = vsel %vm235_vm12, %v238_v48, %v240_v42 }
  0x40   :  { %v150_v61 = vsub.s32 %v146_v32, %v149_v33  ;;  %v270_v35 = vadd.s32 %v268_v57, %v266_v56  ;;  %v290_v16 = vsel %vm289_vm2, 1, %v496_v47  ;;  %v295_v14 = vmul.u32 %v552_v38, %v241_v10 }
  0x41   :  { %v292_v63 = vadd.s32 %v290_v16, %v288_v59  ;;  %v142_v47 = vadd.s32 %v614_v60, %v628_v7  ;;  %vm50_vm7 = vcmp.lt.s32.totalorder %v529_v4, 0  ;;  %vm676_vm8 = vcmp.le.f32.partialorder %v48_v6, 0.7853982 }
  0x42   :  { %vm151_vm3 = vcmp.lt.s32.totalorder %v150_v61, 0  ;;  %v152_v44 = vsub.s32 0, %v150_v61  ;;  %v271_v3 = vadd.s32 %v270_v35, %v260_v15  ;;  %v172_v27 = vsub.s32 4, %v655_v50 }
  0x43   :  { %v293_v24 = vadd.s32 %v292_v63, %v282_v58  ;;  %vm695_vm11 = vcmp.le.f32.partialorder %v202_v8, 0.7853982  ;;  %vm204_vm12 = vcmp.lt.s32.totalorder %v532_v5, 0  ;;  %vm191_vm15 = vweird.f32 %v529_v4 }
  0x44   :  { %v153_v2 = vsel %vm151_vm3, %v152_v44, %v150_v61  ;;  %v272_v11 = vadd.s32 %v271_v3, %v262_v25  ;;  %v173_v15 = vsel %vm50_vm7, %v172_v27, %v655_v50  ;;  %vm345_vm3 = vweird.f32 %v532_v5 }
  0x45   :  { %v154_v12 = vclz %v153_v2  ;;  %v294_v13 = vadd.s32 %v293_v24, %v284_v62  ;;  %v175_v25 = vsel %vm676_vm8, 0, %v173_v15 }
  0x46   :  { %vm297_vm4 = vc.u32 %v272_v11, %v291_v9  ;;  %v296_v42 = vadd.s32 %v291_v9, %v272_v11  ;;  %v192_v9 = vand.u32 3, %v175_v25 }
  0x47   :  { %v393_v17 = vadd.s32 4294967294, %v154_v12  ;;  %v298_v18 = vadd.s32 1, %v294_v13  ;;  %v398_v12 = vadd.f32 -6.2831855, %v524_v0 }
  0x48   :  { %vm197_vm10 = vcmp.eq.s32.totalorder %v192_v9, 2  ;;  %vm194_vm13 = vcmp.eq.s32.totalorder %v192_v9, 0  ;;  %vm193_vm14 = vcmp.lt.s32.totalorder %v192_v9, 2 }
  0x49   :  { %vm394_vm5 = vcmp.lt.s32.totalorder %v393_v17, 0  ;;  %v299_v19 = vsel %vm297_vm4, %v298_v18, %v294_v13  ;;  %v362_v13 = vsub.f32 0.0, %v524_v0 }
  0x4a   :  { %v157_v21 = vsel %vm394_vm5, 0, %v393_v17  ;;  %v300_v22 = vadd.s32 %v299_v19, %v295_v14 }
  0x4b   :  { %v158_v23 = vsub.s32 32, %v157_v21  ;;  %v159_v55 = vshll.u32 %v150_v61, %v157_v21  ;;  %v162_v26 = vsub.s32 4294967266, %v157_v21 }
  0x4c   :  { %v301_v28 = vadd.s32 536870912, %v300_v22 }
  0x4d   :  { %v160_v29 = vshrl.u32 %v142_v47, %v158_v23  ;;  %v163_v30 = vadd.s32 127, %v162_v26  ;;  %v360_v23 = vmax.f32 %v398_v12, 0.0 }
  0x4e   :  { %v670_v20 = vshrl.u32 %v301_v28, 30 }
  0x4f   :  { %v161_v32 = vor.u32 %v160_v29, %v159_v55  ;;  %v164_v38 = vshll.u32 %v163_v30, 23  ;;  %v364_v55 = vmax.f32 %v362_v13, 0.0 }
  0x50   :  { %v303_v34 = vshll.u32 %v670_v20, 30  ;;  %v326_v8 = vsub.s32 4, %v670_v20 }
  0x51   :  { %v165_v36 = vor.u32 4788187, %v164_v38  ;;  %v168_v39 = vcvt.s32.f32 %v161_v32 }
  0x52   :  { %v304_v40 = vsub.s32 %v300_v22, %v303_v34  ;;  %v366_v34 = vadd.f32 %v364_v55, %v360_v23 }
  0x53   :  { %v166_v60 = vand.u32 2147483647, %v165_v36 }
  0x54   :  { %vm305_vm6 = vcmp.lt.s32.totalorder %v304_v40, 0  ;;  %v306_v7 = vsub.s32 0, %v304_v40 }
  0x55   :  { %v169_v41 = vmul.f32 %v168_v39, %v166_v60 }
  0x56   :  { %v307_v43 = vsel %vm305_vm6, %v306_v7, %v304_v40 }
  0x57   :  { %v170_v45 = vxor.u32 2147483648, %v169_v41  ;;  %v308_v46 = vclz %v307_v43 }
  0x59   :  { %v171_v48 = vsel %vm50_vm7, %v170_v45, %v169_v41  ;;  %v396_v37 = vadd.s32 4294967294, %v308_v46 }
  0x5a   :  { %v174_v49 = vsel %vm676_vm8, %v529_v4, %v171_v48  ;;  %v327_v4 = vsel %vm204_vm12, %v326_v8, %v670_v20 }
  0x5b   :  { %v176_v51 = vmul.f32 %v174_v49, %v174_v49  ;;  %vm397_vm9 = vcmp.lt.s32.totalorder %v396_v37, 0  ;;  %v329_v31 = vsel %vm695_vm11, 0, %v327_v4 }
  0x5c   :  { %v311_v52 = vsel %vm397_vm9, 0, %v396_v37  ;;  %v346_v27 = vand.u32 3, %v329_v31 }
  0x5d   :  { %v177_v6 = vmul.f32 -0.001358992, %v176_v51  ;;  %v184_v53 = vmul.f32 -0.00019511016, %v176_v51  ;;  %v312_v54 = vsub.s32 32, %v311_v52  ;;  %v313_v33 = vshll.u32 %v304_v40, %v311_v52 }
  0x5e   :  { %v316_v56 = vsub.s32 4294967266, %v311_v52  ;;  %v363_v52 = vsub.f32 0.0, %v526_v1  ;;  %vm351_vm0 = vcmp.eq.s32.totalorder %v346_v27, 2  ;;  %vm348_vm1 = vcmp.eq.s32.totalorder %v346_v27, 0 }
  0x5f   :  { %v178_v57 = vadd.f32 0.041655596, %v177_v6  ;;  %v185_v58 = vadd.f32 0.008332121, %v184_v53  ;;  %v314_v59 = vshrl.u32 %v296_v42, %v312_v54  ;;  %v399_v42 = vadd.f32 -6.2831855, %v526_v1 }
  0x60   :  { %v317_v61 = vadd.s32 127, %v316_v56  ;;  %v365_v15 = vmax.f32 %v363_v52, 0.0  ;;  %vm347_vm2 = vcmp.lt.s32.totalorder %v346_v27, 2 }
  0x61   :  { %v179_v35 = vmul.f32 %v178_v57, %v176_v51  ;;  %v186_v16 = vmul.f32 %v185_v58, %v176_v51  ;;  %v315_v62 = vor.u32 %v314_v59, %v313_v33  ;;  %v361_v33 = vmax.f32 %v399_v42, 0.0 }
  0x62   :  { %v318_v63 = vshll.u32 %v317_v61, 23 }
  0x63   :  { %v180_v44 = vadd.f32 -0.4999988, %v179_v35  ;;  %v187_v3 = vadd.f32 -0.16666654, %v186_v16  ;;  %v322_v24 = vcvt.s32.f32 %v315_v62  ;;  %v367_v61 = vadd.f32 %v365_v15, %v361_v33 }
  0x64   :  { %v319_v10 = vor.u32 4788187, %v318_v63 }
  0x65   :  { %v181_v2 = vmul.f32 %v180_v44, %v176_v51  ;;  %v188_v11 = vmul.f32 %v187_v3, %v176_v51 }
  0x66   :  { %v320_v50 = vand.u32 2147483647, %v319_v10 }
  0x67   :  { %v182_v14 = vadd.f32 1.0, %v181_v2  ;;  %v189_v17 = vadd.f32 1.0, %v188_v11 }
  0x68   :  { %v323_v18 = vmul.f32 %v322_v24, %v320_v50 }
  0x69   :  { %v190_v47 = vmul.f32 %v189_v17, %v174_v49  ;;  %v198_v19 = vxor.u32 2147483648, %v182_v14 }
  0x6a   :  { %v324_v22 = vxor.u32 2147483648, %v323_v18 }
  0x6b   :  { %v195_v0 = vxor.u32 2147483648, %v190_v47  ;;  %v199_v26 = vsel %vm197_vm10, %v198_v19, %v190_v47 }
  0x6c   :  { %v325_v28 = vsel %vm204_vm12, %v324_v22, %v323_v18 }
  0x6d   :  { %v196_v29 = vsel %vm194_vm13, %v182_v14, %v195_v0  ;;  %v328_v30 = vsel %vm695_vm11, %v532_v5, %v325_v28 }
  0x6e   :  { %v200_v32 = vsel %vm193_vm14, %v196_v29, %v199_v26  ;;  %v330_v38 = vmul.f32 %v328_v30, %v328_v30 }
  0x6f   :  { %v201_v36 = vsel %vm191_vm15, nan, %v200_v32 }
  0x70   :  { %v331_v39 = vmul.f32 -0.001358992, %v330_v38  ;;  %v338_v40 = vmul.f32 -0.00019511016, %v330_v38  ;;  %v356_v60 = vsub.f32 1.0, %v201_v36 }
  0x72   :  { %v332_v7 = vadd.f32 0.041655596, %v331_v39  ;;  %v339_v41 = vadd.f32 0.008332121, %v338_v40  ;;  %v368_v43 = vadd.f32 %v366_v34, %v356_v60 }
  0x74   :  { %v333_v45 = vmul.f32 %v332_v7, %v330_v38  ;;  %v340_v46 = vmul.f32 %v339_v41, %v330_v38  ;;  %372 = vst [vmem:[#allocation9] sm:$0xff] %v368_v43 }
  0x76   :  { %v334_v48 = vadd.f32 -0.4999988, %v333_v45  ;;  %v341_v37 = vadd.f32 -0.16666654, %v340_v46 }
  0x78   :  { %v335_v49 = vmul.f32 %v334_v48, %v330_v38  ;;  %v342_v51 = vmul.f32 %v341_v37, %v330_v38 }
  0x7a   :  { %v336_v6 = vadd.f32 1.0, %v335_v49  ;;  %v343_v20 = vadd.f32 1.0, %v342_v51 }
  0x7c   :  { %v344_v53 = vmul.f32 %v343_v20, %v328_v30  ;;  %v352_v54 = vxor.u32 2147483648, %v336_v6 }
  0x7e   :  { %v349_v56 = vxor.u32 2147483648, %v344_v53  ;;  %v353_v57 = vsel %vm351_vm0, %v352_v54, %v344_v53 }
  0x80   :  { %v350_v58 = vsel %vm348_vm1, %v336_v6, %v349_v56 }
  0x81   :  { %v354_v59 = vsel %vm347_vm2, %v350_v58, %v353_v57 }
  0x82   :  { %v355_v25 = vsel %vm345_vm3, nan, %v354_v59 }
  0x83   :  { %v357_v1 = vsub.f32 1.0, %v355_v25 }
  0x85   :  { %v369_v35 = vadd.f32 %v367_v61, %v357_v1 }
  0x87   :  { %373 = vst [vmem:[#allocation9 + $0x8] sm:$0xff] %v369_v35 }
  0x88   :  { %384 = dma.vmem_to_hbm [thread:$0]  %s380_s2, 256, %s382_s23, [#allocation6]  }
  0x89   :  { %486 = dma.done.wait [#allocation6], 256  }
  0x8a   :  { %487 = vsyncadd [#allocation6], 4294967040 }
  0x8b   :  { %389 = vsyncpa [#allocation5], 1 }
  0x8c   :  { %390 = vsyncpa [#allocation8], 1 }
  0x8d   :  { %391 = vsyncpa [#allocation6], 1 }

</bundles_post_ra>
